<compile_context>
chip_gen: v6e
topology: v6e:2x2x1
jax: 0.10.0
libtpu: 0.0.40
codegen_flags: <defaults>
</compile_context>

<pallas_src>
import jax
import jax.numpy as jnp
from jax import lax
from jax.experimental import pallas as pl
from jax.experimental.pallas import tpu as pltpu

# Small, TPU-tile-friendly shapes: 32 rows x 128-lane feature dims.
D_IN = 128
H = 128
D_OUT = 128
GRAD_ACCUM_STEPS = 4        # loss-scaling constant (micro-batches folded into one step)
MB = 8                      # rows per logical micro-batch
TOTAL_B = MB * GRAD_ACCUM_STEPS


def lora_training_kernel(x_ref, y_ref, w0t_ref, b0_ref, w1t_ref, b1_ref,
                         loss_ref, grad_in_ref):
    x = x_ref[...]                                                   # (TOTAL_B, D_IN)

    # layer 0 (skipped by n_layers_to_skip=1): plain linear, x @ W0.T + b0.
    # W0.T is pre-transposed on the host -> straight MXU push, no XLU .T.
    h = jnp.dot(x, w0t_ref[...], preferred_element_type=jnp.float32) + b0_ref[...]

    # layer 1 (CustomLinear / ForwardModuleLinear, weight_transposed=False):
    # h @ W1.T + b1, with W1.T pre-transposed on the host.
    out = jnp.dot(h, w1t_ref[...], preferred_element_type=jnp.float32) + b1_ref[...]

    # loss = sum over micro-batches of MSE(mean) / gradient_accumulation_steps
    #      = sum(diff^2) / (MB * D_OUT * GRAD_ACCUM_STEPS) = sum(diff^2)/(TOTAL_B*D_OUT)
    diff = out - y_ref[...]                                          # (TOTAL_B, D_OUT)
    inv = 1.0 / (TOTAL_B * D_OUT)
    loss_ref[...] = jnp.reshape(jnp.sum(diff * diff) * inv, (1, 1))

    # loss.backward(): BackwardModuleLinear propagates through the CustomLinear
    # as grad_input = grad_output @ W1.  Only W1.T lives in VMEM, so contract
    # the last dims of both operands (trans_b form) -> (TOTAL_B, H).
    grad_out = (2.0 * inv) * diff                                    # dL/d(out)
    grad_in_ref[...] = lax.dot_general(
        grad_out, w1t_ref[...],
        dimension_numbers=(((1,), (1,)), ((), ())),
        preferred_element_type=jnp.float32)


def lora_training_forward(x, y, w0, b0, w1, b1):
    """Runs one full gradient-accumulation cycle (all TOTAL_B rows) in a single
    pallas_call grid step.

    Returns (loss, grad_norm, grad_in):
      loss      - accumulated sum over micro-batches of MSE / grad_accum_steps
                  (what loss.backward() accumulates over a grad-accum cycle),
      grad_norm - None (calibrate=False / run_optimizer=False default path),
      grad_in   - gradient propagated through the CustomLinear backward module
                  for every row (side effect of loss.backward()).
    """
    # One-time host-side transposes (outside the hot path): forward matmuls
    # consume W.T directly; backward reuses W1.T via a trans_b contraction.
    w0t = w0.T          # (D_IN, H)
    w1t = w1.T          # (H, D_OUT)

    loss2d, grad_in = pl.pallas_call(
        lora_training_kernel,
        out_shape=(
            jax.ShapeDtypeStruct((1, 1), jnp.float32),
            jax.ShapeDtypeStruct((TOTAL_B, H), jnp.float32),
        ),
        grid=(1,),
        in_specs=[
            pl.BlockSpec((TOTAL_B, D_IN), lambda i: (0, 0)),    # x (full batch)
            pl.BlockSpec((TOTAL_B, D_OUT), lambda i: (0, 0)),   # y (full batch)
            pl.BlockSpec((D_IN, H), lambda i: (0, 0)),          # W0.T
            pl.BlockSpec((1, H), lambda i: (0, 0)),             # b0
            pl.BlockSpec((H, D_OUT), lambda i: (0, 0)),         # W1.T (fwd + bwd)
            pl.BlockSpec((1, D_OUT), lambda i: (0, 0)),         # b1
        ],
        out_specs=(
            pl.BlockSpec((1, 1), lambda i: (0, 0)),             # loss scalar
            pl.BlockSpec((TOTAL_B, H), lambda i: (0, 0)),       # grad_in
        ),
        compiler_params=pltpu.CompilerParams(
            dimension_semantics=("arbitrary",)),
    )(x, y, w0t, b0, w1t, b1)

    loss = loss2d[0, 0]
    grad_norm = None  # run_optimizer=False / max_grad_norm=None default path
    # TODO(synk): optimizer.step / lr_scheduler.step / clip_grad_norm_ /
    # zero_grad are host-side training-state mutations with no Pallas
    # equivalent; parameter (LoRA-adapter) grads are not materialized here,
    # matching the run_optimizer=False contract.
    return loss, grad_norm, grad_in


def _reference(x, y, w0, b0, w1, b1):
    h = jnp.dot(x, w0.T, preferred_element_type=jnp.float32) + b0
    out = jnp.dot(h, w1.T, preferred_element_type=jnp.float32) + b1
    diff = out - y
    inv = 1.0 / (TOTAL_B * D_OUT)
    loss = jnp.sum(diff * diff) * inv          # sum over micro-batches of MSE/GAS
    grad_out = (2.0 * inv) * diff
    grad_in = jnp.dot(grad_out, w1, preferred_element_type=jnp.float32)
    return loss, grad_in


if __name__ == "__main__":
    key = jax.random.PRNGKey(0)
    kx, ky, k0, kb0, k1, kb1 = jax.random.split(key, 6)

    x = jax.random.normal(kx, (TOTAL_B, D_IN), dtype=jnp.float32)
    y = jax.random.normal(ky, (TOTAL_B, D_OUT), dtype=jnp.float32)
    # PyTorch nn.Linear weight convention: (out_features, in_features).
    w0 = jax.random.normal(k0, (H, D_IN), dtype=jnp.float32) * 0.1
    b0 = jax.random.normal(kb0, (1, H), dtype=jnp.float32) * 0.1
    w1 = jax.random.normal(k1, (D_OUT, H), dtype=jnp.float32) * 0.1
    b1 = jax.random.normal(kb1, (1, D_OUT), dtype=jnp.float32) * 0.1

    loss, grad_norm, grad_in = lora_training_forward(x, y, w0, b0, w1, b1)
    jax.block_until_ready((loss, grad_in))

    ref_loss, ref_grad_in = _reference(x, y, w0, b0, w1, b1)
    assert jnp.allclose(loss, ref_loss, rtol=5e-3, atol=5e-3), (loss, ref_loss)
    assert jnp.allclose(grad_in, ref_grad_in, rtol=5e-3, atol=1e-5)
    assert grad_norm is None

    print("KERNEL_OK")
</pallas_src>

<mosaic_0001>
module attributes {stable_mosaic.version = 11 : i64} {
  func.func @lora_training_kernel(%arg0: i32, %arg1: memref<32x128xf32, #tpu.memory_space<vmem>>, %arg2: memref<32x128xf32, #tpu.memory_space<vmem>>, %arg3: memref<128x128xf32, #tpu.memory_space<vmem>>, %arg4: memref<1x128xf32, #tpu.memory_space<vmem>>, %arg5: memref<128x128xf32, #tpu.memory_space<vmem>>, %arg6: memref<1x128xf32, #tpu.memory_space<vmem>>, %arg7: memref<1x1xf32, #tpu.memory_space<vmem>>, %arg8: memref<32x128xf32, #tpu.memory_space<vmem>>) attributes {dimension_semantics = [#tpu.dimension_semantics<arbitrary>], iteration_bounds = array<i64: 1>, scalar_prefetch = 0 : i64, scratch_operands = 0 : i64, tpu.core_type = #tpu.core_type<tc>, window_params = [{pipeline_mode = #tpu.pipeline_mode<synchronous>, transform_indices = @transform_0, window_bounds = array<i64: 32, 128>}, {pipeline_mode = #tpu.pipeline_mode<synchronous>, transform_indices = @transform_1, window_bounds = array<i64: 32, 128>}, {pipeline_mode = #tpu.pipeline_mode<synchronous>, transform_indices = @transform_2, window_bounds = array<i64: 128, 128>}, {pipeline_mode = #tpu.pipeline_mode<synchronous>, transform_indices = @transform_3, window_bounds = array<i64: 1, 128>}, {pipeline_mode = #tpu.pipeline_mode<synchronous>, transform_indices = @transform_4, window_bounds = array<i64: 128, 128>}, {pipeline_mode = #tpu.pipeline_mode<synchronous>, transform_indices = @transform_5, window_bounds = array<i64: 1, 128>}, {pipeline_mode = #tpu.pipeline_mode<synchronous>, transform_indices = @transform_6, window_bounds = array<i64: 1, 1>}, {pipeline_mode = #tpu.pipeline_mode<synchronous>, transform_indices = @transform_7, window_bounds = array<i64: 32, 128>}]} {
    %c0 = arith.constant 0 : index
    %c0_0 = arith.constant 0 : index
    %0 = vector.load %arg1[%c0, %c0_0] : memref<32x128xf32, #tpu.memory_space<vmem>>, vector<32x128xf32>
    %c0_1 = arith.constant 0 : index
    %c0_2 = arith.constant 0 : index
    %1 = vector.load %arg3[%c0_1, %c0_2] : memref<128x128xf32, #tpu.memory_space<vmem>>, vector<128x128xf32>
    %cst = arith.constant dense<0.000000e+00> : vector<32x128xf32>
    %2 = tpu.matmul %0, %1, %cst {dimension_numbers = #tpu.dot_dimension_numbers<[1], [0], [0], [1], [0, 0, 1, 1], [], []>} : vector<32x128xf32>, vector<128x128xf32>, vector<32x128xf32> -> vector<32x128xf32>
    %c0_3 = arith.constant 0 : index
    %c0_4 = arith.constant 0 : index
    %3 = vector.load %arg4[%c0_3, %c0_4] : memref<1x128xf32, #tpu.memory_space<vmem>>, vector<1x128xf32>
    %4 = vector.broadcast %3 : vector<1x128xf32> to vector<32x128xf32>
    %5 = arith.addf %2, %4 : vector<32x128xf32>
    %c0_5 = arith.constant 0 : index
    %c0_6 = arith.constant 0 : index
    %6 = vector.load %arg5[%c0_5, %c0_6] : memref<128x128xf32, #tpu.memory_space<vmem>>, vector<128x128xf32>
    %cst_7 = arith.constant dense<0.000000e+00> : vector<32x128xf32>
    %7 = tpu.matmul %5, %6, %cst_7 {dimension_numbers = #tpu.dot_dimension_numbers<[1], [0], [0], [1], [0, 0, 1, 1], [], []>} : vector<32x128xf32>, vector<128x128xf32>, vector<32x128xf32> -> vector<32x128xf32>
    %c0_8 = arith.constant 0 : index
    %c0_9 = arith.constant 0 : index
    %8 = vector.load %arg6[%c0_8, %c0_9] : memref<1x128xf32, #tpu.memory_space<vmem>>, vector<1x128xf32>
    %9 = vector.broadcast %8 : vector<1x128xf32> to vector<32x128xf32>
    %10 = arith.addf %7, %9 : vector<32x128xf32>
    %c0_10 = arith.constant 0 : index
    %c0_11 = arith.constant 0 : index
    %11 = vector.load %arg2[%c0_10, %c0_11] : memref<32x128xf32, #tpu.memory_space<vmem>>, vector<32x128xf32>
    %12 = arith.subf %10, %11 : vector<32x128xf32>
    %13 = arith.mulf %12, %12 : vector<32x128xf32>
    %14 = vector.shape_cast %13 : vector<32x128xf32> to vector<1x32x128xf32>
    %cst_12 = arith.constant dense<0.000000e+00> : vector<1xf32>
    %15 = vector.multi_reduction <add>, %14, %cst_12 [1, 2] : vector<1x32x128xf32> to vector<1xf32>
    %16 = vector.shape_cast %15 : vector<1xf32> to vector<1x1x1xf32>
    %17 = vector.extract %16[0, 0, 0] : f32 from vector<1x1x1xf32>
    %cst_13 = arith.constant 2.44140625E-4 : f32
    %18 = arith.mulf %17, %cst_13 : f32
    %19 = vector.broadcast %18 : f32 to vector<1x1xf32>
    %c0_14 = arith.constant 0 : index
    %c0_15 = arith.constant 0 : index
    %20 = vector.load %arg7[%c0_14, %c0_15] : memref<1x1xf32, #tpu.memory_space<vmem>>, vector<1x1xf32>
    tpu.vector_store %arg7[%c0_14, %c0_15], %19 {strides = array<i32>} : memref<1x1xf32, #tpu.memory_space<vmem>>, vector<1x1xf32>,
    %cst_16 = arith.constant 4.8828125E-4 : f32
    %21 = vector.broadcast %cst_16 : f32 to vector<32x128xf32>
    %22 = arith.mulf %21, %12 : vector<32x128xf32>
    %c0_17 = arith.constant 0 : index
    %c0_18 = arith.constant 0 : index
    %23 = vector.load %arg5[%c0_17, %c0_18] : memref<128x128xf32, #tpu.memory_space<vmem>>, vector<128x128xf32>
    %cst_19 = arith.constant dense<0.000000e+00> : vector<32x128xf32>
    %24 = tpu.matmul %22, %23, %cst_19 {dimension_numbers = #tpu.dot_dimension_numbers<[1], [1], [0], [0], [0, 0, 1, 0], [], []>} : vector<32x128xf32>, vector<128x128xf32>, vector<32x128xf32> -> vector<32x128xf32>
    %c0_20 = arith.constant 0 : index
    %c0_21 = arith.constant 0 : index
    %25 = vector.load %arg8[%c0_20, %c0_21] : memref<32x128xf32, #tpu.memory_space<vmem>>, vector<32x128xf32>
    tpu.vector_store %arg8[%c0_20, %c0_21], %24 {strides = array<i32>} : memref<32x128xf32, #tpu.memory_space<vmem>>, vector<32x128xf32>,
    return
  }
  func.func @transform_0(%arg0: i32) -> (i32, i32) {
    %c0_i32 = arith.constant 0 : i32
    %c0_i32_0 = arith.constant 0 : i32
    %c0_i32_1 = arith.constant 0 : i32
    return %c0_i32, %c0_i32_0 : i32, i32
  }
  func.func @transform_1(%arg0: i32) -> (i32, i32) {
    %c0_i32 = arith.constant 0 : i32
    %c0_i32_0 = arith.constant 0 : i32
    %c0_i32_1 = arith.constant 0 : i32
    return %c0_i32, %c0_i32_0 : i32, i32
  }
  func.func @transform_2(%arg0: i32) -> (i32, i32) {
    %c0_i32 = arith.constant 0 : i32
    %c0_i32_0 = arith.constant 0 : i32
    %c0_i32_1 = arith.constant 0 : i32
    return %c0_i32, %c0_i32_0 : i32, i32
  }
  func.func @transform_3(%arg0: i32) -> (i32, i32) {
    %c0_i32 = arith.constant 0 : i32
    %c0_i32_0 = arith.constant 0 : i32
    %c0_i32_1 = arith.constant 0 : i32
    return %c0_i32, %c0_i32_0 : i32, i32
  }
  func.func @transform_4(%arg0: i32) -> (i32, i32) {
    %c0_i32 = arith.constant 0 : i32
    %c0_i32_0 = arith.constant 0 : i32
    %c0_i32_1 = arith.constant 0 : i32
    return %c0_i32, %c0_i32_0 : i32, i32
  }
  func.func @transform_5(%arg0: i32) -> (i32, i32) {
    %c0_i32 = arith.constant 0 : i32
    %c0_i32_0 = arith.constant 0 : i32
    %c0_i32_1 = arith.constant 0 : i32
    return %c0_i32, %c0_i32_0 : i32, i32
  }
  func.func @transform_6(%arg0: i32) -> (i32, i32) {
    %c0_i32 = arith.constant 0 : i32
    %c0_i32_0 = arith.constant 0 : i32
    %c0_i32_1 = arith.constant 0 : i32
    return %c0_i32, %c0_i32_0 : i32, i32
  }
  func.func @transform_7(%arg0: i32) -> (i32, i32) {
    %c0_i32 = arith.constant 0 : i32
    %c0_i32_0 = arith.constant 0 : i32
    %c0_i32_1 = arith.constant 0 : i32
    return %c0_i32, %c0_i32_0 : i32, i32
  }
}

</mosaic_0001>

<bundles_post_ra>
// kernel: tpu_custom_call.1
= control target key start
LH: loop header
LB: loop body
LE: loop exit
PB: predicated region body
PF: predicated region fallthrough
CT: control target
= control target key end

     0   :  { %13 = vsyncpa [#allocation3], 0  ;;  %s881_s0 = inlined_call_operand.hbm [shape: f32[32,128], index: 0, kind: input, shape index: {}]   ;;  %s882_s1 = inlined_call_operand.hbm [shape: f32[32,128], index: 1, kind: input, shape index: {}]   ;;  %s883_s2 = inlined_call_operand.hbm [shape: f32[128,128], index: 2, kind: input, shape index: {}]   ;;  %s884_s3 = inlined_call_operand.vmem [shape: f32[1,128], index: 3, kind: input, shape index: {}]   ;;  %s885_s4 = inlined_call_operand.hbm [shape: f32[128,128], index: 4, kind: input, shape index: {}]   ;;  %s886_s5 = inlined_call_operand.vmem [shape: f32[1,128], index: 5, kind: input, shape index: {}]   ;;  %s887_s6 = inlined_call_operand.hbm [shape: f32[1,1], index: 6, kind: output, shape index: {0}]   ;;  %s888_s7 = inlined_call_operand.hbm [shape: f32[32,128], index: 7, kind: output, shape index: {1}]  }
   0x1   :  { %14 = vsyncpa [#allocation6], 0 }
   0x2   :  { %15 = vsyncpa [#allocation9], 0 }
   0x3   :  { %16 = vsyncpa [#allocation4], 0 }
   0x4   :  { %17 = vsyncpa [#allocation12], 0  ;;  %s788_s24 = smov [#allocation5]   ;;  %s789_s26 = smov [#allocation2]  }
   0x5   :  { %s35_s25 = sshll.u32 %s788_s24, 4  ;;  %s23_s27 = sshll.u32 %s789_s26, 4  ;;  %s36_s25 = int_to_ptr.vmem [resolvable:$true] %s35_s25  ;;  %s24_s27 = int_to_ptr.vmem [resolvable:$true] %s23_s27 }
   0x6   :  { %s666_s28 = scalar_lea.vmem %s36_s25, 512  ;;  %p671_p1 = scmp.lt.s32.totalorder %s36_s25, %s36_s25 }
   0x7   :  { %p667_p0 = scmp.ne.s32.totalorder %s36_s25, %s666_s28  ;;  %p672_p2 = scmp.lt.s32.totalorder %s666_s28, %s666_s28 }
   0x9   :  { %p673_p3 = por %p672_p2, %p671_p1 }
   0xb   :  { %p674_p4 = pnand %p673_p3, %p667_p0 }
   0xd   :  { %677 = shalt.err (!%p674_p4)
}
   0xe   :  { %s790_s29 = smov 128   ;;  %s791_s30 = smov 8  }
   0xf   :  { %41 = dma.hbm_to_vmem [thread:$0]  %s882_s1, 512, %s36_s25, [#allocation6], %s790_s29, %s790_s29, %s791_s30  }
  0x10   :  { %s686_s10 = scalar_lea.vmem %s24_s27, 512  ;;  %p691_p6 = scmp.lt.s32.totalorder %s24_s27, %s24_s27 }
  0x11   :  { %p687_p5 = scmp.ne.s32.totalorder %s24_s27, %s686_s10  ;;  %p692_p7 = scmp.lt.s32.totalorder %s686_s10, %s686_s10 }
  0x13   :  { %p693_p8 = por %p692_p7, %p691_p6 }
  0x15   :  { %p694_p9 = pnand %p693_p8, %p687_p5 }
  0x17   :  { %697 = shalt.err (!%p694_p9)
}
  0x18   :  { %29 = dma.hbm_to_vmem [thread:$0]  %s881_s0, 512, %s24_s27, [#allocation3], %s790_s29, %s790_s29, %s791_s30  }
  0x19   :  { %s792_s13 = smov [#allocation7]   ;;  %s793_s15 = smov [#allocation8]  }
  0x1a   :  { %s47_s14 = sshll.u32 %s792_s13, 4  ;;  %s61_s16 = sshll.u32 %s793_s15, 4  ;;  %s48_s14 = int_to_ptr.vmem [resolvable:$true] %s47_s14  ;;  %s62_s16 = int_to_ptr.vmem [resolvable:$true] %s61_s16 }
  0x1b   :  { %s706_s1 = scalar_lea.vmem %s48_s14, 2048  ;;  %p711_p11 = scmp.lt.s32.totalorder %s48_s14, %s48_s14 }
  0x1c   :  { %p707_p10 = scmp.ne.s32.totalorder %s48_s14, %s706_s1  ;;  %p712_p12 = scmp.lt.s32.totalorder %s706_s1, %s706_s1 }
  0x1e   :  { %p713_p13 = por %p712_p12, %p711_p11 }
  0x20   :  { %p714_p0 = pnand %p713_p13, %p707_p10 }
  0x22   :  { %717 = shalt.err (!%p714_p0)
}
  0x23   :  { %53 = dma.hbm_to_vmem [thread:$0]  %s883_s2, 2048, %s48_s14, [#allocation6], %s790_s29, %s790_s29, %s791_s30  }
  0x24   :  { %s726_s0 = scalar_lea.vmem %s62_s16, 2048  ;;  %p731_p2 = scmp.lt.s32.totalorder %s62_s16, %s62_s16 }
  0x25   :  { %p727_p1 = scmp.ne.s32.totalorder %s62_s16, %s726_s0  ;;  %p732_p3 = scmp.lt.s32.totalorder %s726_s0, %s726_s0 }
  0x27   :  { %p733_p4 = por %p732_p3, %p731_p2 }
  0x29   :  { %p734_p5 = pnand %p733_p4, %p727_p1 }
  0x2b   :  { %737 = shalt.err (!%p734_p5)
}
  0x2c   :  { %67 = dma.hbm_to_vmem [thread:$0]  %s885_s4, 2048, %s62_s16, [#allocation9], %s790_s29, %s790_s29, %s791_s30  }
  0x2d   :  { %778 = dma.done.wait [#allocation3], 512  }
  0x2e   :  { %779 = vsyncadd [#allocation3], 4294966784 }
  0x2f   :  { %780 = dma.done.wait [#allocation6], 2560  }
  0x30   :  { %781 = vsyncadd [#allocation6], 4294964736 }
  0x31   :  { %782 = dma.done.wait [#allocation9], 2048  }
  0x32   :  { %783 = vsyncadd [#allocation9], 4294965248  ;;  %v101_v0 = vld [vmem:[#allocation7 + $0x78] sm:$0xff]  ;;  %v100_v1 = vld [vmem:[#allocation7 + $0x70] sm:$0xff] }
  0x33   :  { %534 = vmatprep.subr.mxu1 %v101_v0  ;;  %v99_v2 = vld [vmem:[#allocation7 + $0x68] sm:$0xff]  ;;  %v98_v3 = vld [vmem:[#allocation7 + $0x60] sm:$0xff]  ;;  %v97_v5 = vld [vmem:[#allocation7 + $0x58] sm:$0xff] }
  0x34   :  { %535 = vmatpush3.msra.mxu1 %v101_v0  ;;  %v82_v4 = vld [vmem:[#allocation2] sm:$0xff]  ;;  %v860_v6 = vld [vmem:[#allocation8 + $0x78] sm:$0xff]  ;;  %v96_v7 = vld [vmem:[#allocation7 + $0x50] sm:$0xff] }
  0x35   :  { %536 = vmatprep.subr.mxu1 %v100_v1  ;;  %566 = vmatprep.mubr.f32.mxu1 %v82_v4  ;;  %v208_v8 = vld [vmem:[#allocation8 + $0x70] sm:$0xff]  ;;  %v95_v9 = vld [vmem:[#allocation7 + $0x48] sm:$0xff]  ;;  %v94_v10 = vld [vmem:[#allocation7 + $0x40] sm:$0xff] }
  0x36   :  { %537 = vmatpush3.msra.mxu1 %v100_v1  ;;  %610 = vmatprep.subr.mxu0 %v860_v6  ;;  %v207_v11 = vld [vmem:[#allocation8 + $0x68] sm:$0xff]  ;;  %v93_v12 = vld [vmem:[#allocation7 + $0x38] sm:$0xff]  ;;  %v92_v13 = vld [vmem:[#allocation7 + $0x30] sm:$0xff] }
  0x37   :  { %538 = vmatprep.subr.mxu1 %v99_v2  ;;  %611 = vmatpush3.xpose.msra.mxu0 %v860_v6  ;;  %v206_v14 = vld [vmem:[#allocation8 + $0x60] sm:$0xff]  ;;  %v91_v15 = vld [vmem:[#allocation7 + $0x28] sm:$0xff]  ;;  %v205_v17 = vld [vmem:[#allocation8 + $0x58] sm:$0xff] }
  0x38   :  { %539 = vmatpush3.msra.mxu1 %v99_v2  ;;  %612 = vmatprep.subr.mxu0 %v208_v8  ;;  %v90_v16 = vld [vmem:[#allocation7 + $0x20] sm:$0xff]  ;;  %v89_v18 = vld [vmem:[#allocation7 + $0x18] sm:$0xff]  ;;  %v88_v19 = vld [vmem:[#allocation7 + $0x10] sm:$0xff] }
  0x39   :  { %540 = vmatprep.subr.mxu1 %v98_v3  ;;  %v204_v20 = vld [vmem:[#allocation8 + $0x50] sm:$0xff]  ;;  %v87_v21 = vld [vmem:[#allocation7 + $0x8] sm:$0xff]  ;;  %v86_v22 = vld [vmem:[#allocation7] sm:$0xff] }
  0x3a   :  { %541 = vmatpush3.msra.mxu1 %v98_v3  ;;  %v203_v23 = vld [vmem:[#allocation8 + $0x48] sm:$0xff]  ;;  %v84_v25 = vld [vmem:[#allocation2 + $0x10] sm:$0xff]  ;;  %v85_v26 = vld [vmem:[#allocation2 + $0x18] sm:$0xff] }
  0x3b   :  { %542 = vmatprep.subr.mxu1 %v97_v5  ;;  %613 = vmatpush3.xpose.msra.mxu0 %v208_v8  ;;  %v83_v24 = vld [vmem:[#allocation2 + $0x8] sm:$0xff]  ;;  %v202_v27 = vld [vmem:[#allocation8 + $0x40] sm:$0xff]  ;;  %v201_v28 = vld [vmem:[#allocation8 + $0x38] sm:$0xff] }
  0x3c   :  { %543 = vmatpush3.msra.mxu1 %v97_v5  ;;  %614 = vmatprep.subr.mxu0 %v207_v11  ;;  %v200_v29 = vld [vmem:[#allocation8 + $0x30] sm:$0xff]  ;;  %v199_v30 = vld [vmem:[#allocation8 + $0x28] sm:$0xff]  ;;  %v198_v31 = vld [vmem:[#allocation8 + $0x20] sm:$0xff] }
  0x3d   :  { %544 = vmatprep.subr.mxu1 %v96_v7  ;;  %v197_v32 = vld [vmem:[#allocation8 + $0x18] sm:$0xff]  ;;  %v196_v33 = vld [vmem:[#allocation8 + $0x10] sm:$0xff]  ;;  %v195_v34 = vld [vmem:[#allocation8 + $0x8] sm:$0xff] }
  0x3e   :  { %545 = vmatpush3.msra.mxu1 %v96_v7  ;;  %v194_v35 = vld [vmem:[#allocation8] sm:$0xff]  ;;  %v303_v48 = vld [vmem:[#allocation5 + $0x8] sm:$0xff]  ;;  %v305_v55 = vld [vmem:[#allocation5 + $0x18] sm:$0xff] }
  0x3f   :  { %546 = vmatprep.subr.mxu1 %v95_v9  ;;  %615 = vmatpush3.xpose.msra.mxu0 %v207_v11  ;;  %v472_v37 = vld [vmem:[%s884_s3] ss:$0 sm:$0xff]  ;;  %v304_v58 = vld [vmem:[#allocation5 + $0x10] sm:$0xff]  ;;  %s794_s3 = smov [#allocation11]  }
  0x40   :  { %547 = vmatpush3.msra.mxu1 %v95_v9  ;;  %616 = vmatprep.subr.mxu0 %v206_v14  ;;  %v473_v45 = vld [vmem:[%s886_s5] ss:$0 sm:$0xff]  ;;  %s454_s5 = sshll.u32 %s794_s3, 4  ;;  %s455_s5 = int_to_ptr.vmem [resolvable:$true] %s454_s5 }
  0x41   :  { %548 = vmatprep.subr.mxu1 %v94_v10  ;;  %v302_v50 = vld [vmem:[#allocation5] sm:$0xff]  ;;  %s738_s23 = scalar_lea.vmem %s455_s5, 512  ;;  %p743_p7 = scmp.lt.s32.totalorder %s455_s5, %s455_s5 }
  0x42   :  { %549 = vmatpush3.msra.mxu1 %v94_v10  ;;  %p739_p6 = scmp.ne.s32.totalorder %s455_s5, %s738_s23  ;;  %p744_p8 = scmp.lt.s32.totalorder %s738_s23, %s738_s23 }
  0x43   :  { %550 = vmatprep.subr.mxu1 %v93_v12  ;;  %617 = vmatpush3.xpose.msra.mxu0 %v206_v14 }
  0x44   :  { %551 = vmatpush3.msra.mxu1 %v93_v12  ;;  %618 = vmatprep.subr.mxu0 %v205_v17  ;;  %p745_p9 = por %p744_p8, %p743_p7 }
  0x45   :  { %552 = vmatprep.subr.mxu1 %v92_v13 }
  0x46   :  { %553 = vmatpush3.msra.mxu1 %v92_v13  ;;  %p746_p10 = pnand %p745_p9, %p739_p6 }
  0x47   :  { %554 = vmatprep.subr.mxu1 %v91_v15  ;;  %619 = vmatpush3.xpose.msra.mxu0 %v205_v17 }
  0x48   :  { %555 = vmatpush3.msra.mxu1 %v91_v15  ;;  %620 = vmatprep.subr.mxu0 %v204_v20 }
  0x49   :  { %556 = vmatprep.subr.mxu1 %v90_v16 }
  0x4a   :  { %557 = vmatpush3.msra.mxu1 %v90_v16 }
  0x4b   :  { %558 = vmatprep.subr.mxu1 %v89_v18  ;;  %621 = vmatpush3.xpose.msra.mxu0 %v204_v20 }
  0x4c   :  { %559 = vmatpush3.msra.mxu1 %v89_v18  ;;  %622 = vmatprep.subr.mxu0 %v203_v23 }
  0x4d   :  { %560 = vmatprep.subr.mxu1 %v88_v19 }
  0x4e   :  { %561 = vmatpush3.msra.mxu1 %v88_v19 }
  0x4f   :  { %562 = vmatprep.subr.mxu1 %v87_v21  ;;  %623 = vmatpush3.xpose.msra.mxu0 %v203_v23 }
  0x50   :  { %563 = vmatpush3.msra.mxu1 %v87_v21  ;;  %624 = vmatprep.subr.mxu0 %v202_v27 }
  0x51   :  { %564 = vmatprep.subr.mxu1 %v86_v22 }
  0x52   :  { %565 = vmatpush3.msra.mxu1 %v86_v22 }
  0x53   :  { %567 = vmatmul.mubr.f32.vlgmr.msra.gmra.mxu1 %v83_v24  ;;  %572 = vmatprep.subr.mxu1 %v860_v6 }
  0x54   :  { %569 = vmatprep.mubr.f32.mxu1 %v84_v25  ;;  %573 = vmatpush3.msra.mxu1 %v860_v6 }
  0x55   :  { %574 = vmatprep.subr.mxu1 %v208_v8  ;;  %625 = vmatpush3.xpose.msra.mxu0 %v202_v27 }
  0x56   :  { %575 = vmatpush3.msra.mxu1 %v208_v8  ;;  %626 = vmatprep.subr.mxu0 %v201_v28 }
  0x57   :  { %570 = vmatmul.mubr.f32.gmra.mxu1 %v85_v26  ;;  %576 = vmatprep.subr.mxu1 %v207_v11 }
  0x58   :  { %577 = vmatpush3.msra.mxu1 %v207_v11 }
  0x59   :  { %578 = vmatprep.subr.mxu1 %v206_v14  ;;  %627 = vmatpush3.xpose.msra.mxu0 %v201_v28 }
  0x5a   :  { %579 = vmatpush3.msra.mxu1 %v206_v14  ;;  %628 = vmatprep.subr.mxu0 %v200_v29 }
  0x5b   :  { %580 = vmatprep.subr.mxu1 %v205_v17 }
  0x5c   :  { %581 = vmatpush3.msra.mxu1 %v205_v17 }
  0x5d   :  { %582 = vmatprep.subr.mxu1 %v204_v20  ;;  %629 = vmatpush3.xpose.msra.mxu0 %v200_v29 }
  0x5e   :  { %583 = vmatpush3.msra.mxu1 %v204_v20  ;;  %630 = vmatprep.subr.mxu0 %v199_v30 }
  0x5f   :  { %584 = vmatprep.subr.mxu1 %v203_v23 }
  0x60   :  { %585 = vmatpush3.msra.mxu1 %v203_v23 }
  0x61   :  { %586 = vmatprep.subr.mxu1 %v202_v27  ;;  %631 = vmatpush3.xpose.msra.mxu0 %v199_v30 }
  0x62   :  { %587 = vmatpush3.msra.mxu1 %v202_v27  ;;  %632 = vmatprep.subr.mxu0 %v198_v31 }
  0x63   :  { %588 = vmatprep.subr.mxu1 %v201_v28 }
  0x64   :  { %589 = vmatpush3.msra.mxu1 %v201_v28 }
  0x65   :  { %590 = vmatprep.subr.mxu1 %v200_v29  ;;  %633 = vmatpush3.xpose.msra.mxu0 %v198_v31 }
  0x66   :  { %591 = vmatpush3.msra.mxu1 %v200_v29  ;;  %634 = vmatprep.subr.mxu0 %v197_v32 }
  0x67   :  { %592 = vmatprep.subr.mxu1 %v199_v30 }
  0x68   :  { %593 = vmatpush3.msra.mxu1 %v199_v30 }
  0x69   :  { %594 = vmatprep.subr.mxu1 %v198_v31  ;;  %635 = vmatpush3.xpose.msra.mxu0 %v197_v32 }
  0x6a   :  { %595 = vmatpush3.msra.mxu1 %v198_v31  ;;  %636 = vmatprep.subr.mxu0 %v196_v33 }
  0x6b   :  { %596 = vmatprep.subr.mxu1 %v197_v32 }
  0x6c   :  { %597 = vmatpush3.msra.mxu1 %v197_v32 }
  0x6d   :  { %598 = vmatprep.subr.mxu1 %v196_v33  ;;  %637 = vmatpush3.xpose.msra.mxu0 %v196_v33 }
  0x6e   :  { %599 = vmatpush3.msra.mxu1 %v196_v33  ;;  %638 = vmatprep.subr.mxu0 %v195_v34 }
  0x6f   :  { %600 = vmatprep.subr.mxu1 %v195_v34 }
  0x70   :  { %601 = vmatpush3.msra.mxu1 %v195_v34 }
  0x71   :  { %602 = vmatprep.subr.mxu1 %v194_v35  ;;  %639 = vmatpush3.xpose.msra.mxu0 %v195_v34 }
  0x72   :  { %603 = vmatpush3.msra.mxu1 %v194_v35  ;;  %640 = vmatprep.subr.mxu0 %v194_v35 }
  0x75   :  { %641 = vmatpush3.xpose.msra.mxu0 %v194_v35 }
 0x113   :  { %v568_v36 = vpop.f32.mrf.mxu1 }
 0x114   :  { %v181_v40 = vadd.f32 %v568_v36, %v472_v37 }
 0x115   :  { %v175_v38 = vpop.f32.mrf.mxu1 }
 0x116   :  { %v176_v39 = vadd.f32 %v472_v37, %v175_v38 }
 0x117   :  { %v571_v41 = vpop.f32.mrf.mxu1 }
 0x118   :  { %604 = vmatprep.mubr.f32.mxu1 %v176_v39  ;;  %v191_v44 = vadd.f32 %v571_v41, %v472_v37 }
 0x119   :  { %v185_v42 = vpop.f32.mrf.mxu1  ;;  %605 = vmatmul.mubr.f32.vlgmr.msra.gmra.mxu1 %v181_v40 }
 0x11a   :  { %v186_v43 = vadd.f32 %v472_v37, %v185_v42 }
 0x11c   :  { %607 = vmatprep.mubr.f32.mxu1 %v186_v43 }
 0x11d   :  { %608 = vmatmul.mubr.f32.gmra.mxu1 %v191_v44 }
 0x1d9   :  { %v606_v46 = vpop.f32.mrf.mxu1 }
 0x1da   :  { %v289_v47 = vadd.f32 %v606_v46, %v473_v45 }
 0x1db   :  { %v283_v49 = vpop.f32.mrf.mxu1 }
 0x1dc   :  { %v284_v51 = vadd.f32 %v473_v45, %v283_v49  ;;  %v307_v52 = vsub.f32 %v289_v47, %v303_v48 }
 0x1dd   :  { %v609_v53 = vpop.f32.mrf.mxu1 }
 0x1de   :  { %v299_v54 = vadd.f32 %v609_v53, %v473_v45  ;;  %v306_v56 = vsub.f32 %v284_v51, %v302_v50  ;;  %v331_v63 = vmul.f32 0.00048828125, %v307_v52  ;;  %v311_v0 = vmul.f32 %v307_v52, %v307_v52 }
 0x1df   :  { %v293_v57 = vpop.f32.mrf.mxu1 }
 0x1e0   :  { %v294_v59 = vadd.f32 %v473_v45, %v293_v57  ;;  %v310_v60 = vmul.f32 %v306_v56, %v306_v56  ;;  %v330_v61 = vmul.f32 0.00048828125, %v306_v56  ;;  %v309_v62 = vsub.f32 %v299_v54, %v305_v55 }
 0x1e2   :  { %v308_v1 = vsub.f32 %v294_v59, %v304_v58  ;;  %642 = vmatprep.mubr.f32.mxu0 %v330_v61  ;;  %v314_v4 = vadd.f32 %v311_v0, %v310_v60  ;;  %v333_v5 = vmul.f32 0.00048828125, %v309_v62  ;;  %v313_v6 = vmul.f32 %v309_v62, %v309_v62 }
 0x1e3   :  { %643 = vmatmul.mubr.f32.vlgmr.msra.gmra.mxu0 %v331_v63 }
 0x1e4   :  { %v332_v2 = vmul.f32 0.00048828125, %v308_v1  ;;  %v312_v3 = vmul.f32 %v308_v1, %v308_v1 }
 0x1e6   :  { %645 = vmatprep.mubr.f32.mxu0 %v332_v2  ;;  %v315_v7 = vadd.f32 %v314_v4, %v312_v3 }
 0x1e7   :  { %646 = vmatmul.mubr.f32.gmra.mxu0 %v333_v5 }
 0x1e8   :  { %v316_v8 = vadd.f32 %v315_v7, %v313_v6 }
 0x1ea   :  { %317 = vadd.xlane.f32.xlu0 %v316_v8 }
 0x273   :  { %v318_v9 = vpop.xlane.xlu0 %317 }
 0x274   :  { %v319_v10 = vrot.slane %v318_v9, 4 }
 0x276   :  { %v320_v11 = vadd.f32 %v319_v10, %v318_v9 }
 0x278   :  { %v321_v12 = vrot.slane %v320_v11, 2 }
 0x27a   :  { %v322_v13 = vadd.f32 %v321_v12, %v320_v11 }
 0x27c   :  { %v323_v14 = vrot.slane %v322_v13, 1 }
 0x27e   :  { %v324_v15 = vadd.f32 %v323_v14, %v322_v13 }
 0x280   :  { %648 = vpush %v324_v15 }
 0x2a3   :  { %v644_v16 = vpop.f32.mrf.mxu0 }
 0x2a4   :  { %436 = vst [vmem:[#allocation11 + $0x8] sm:$0xff] %v644_v16 }
 0x2a5   :  { %v416_v17 = vpop.f32.mrf.mxu0 }
 0x2a6   :  { %435 = vst [vmem:[#allocation11] sm:$0xff] %v416_v17 }
 0x2a7   :  { %v647_v18 = vpop.f32.mrf.mxu0 }
 0x2a8   :  { %438 = vst [vmem:[#allocation11 + $0x18] sm:$0xff] %v647_v18 }
 0x2a9   :  { %v426_v19 = vpop.f32.mrf.mxu0 }
 0x2aa   :  { %437 = vst [vmem:[#allocation11 + $0x10] sm:$0xff] %v426_v19 }
 0x2ab   :  { %749 = shalt.err (!%p746_p10)
}
 0x2ac   :  { %460 = dma.vmem_to_hbm [thread:$0]  %s455_s5, 512, %s888_s7, [#allocation12], %s790_s29, %s790_s29, %s791_s30   ;;  %vm328_vm0 = vcmask 0  }
 0x2ad   :  { %s795_s26 = smov [#allocation10]  }
 0x2ae   :  { %s445_s27 = sshll.u32 %s795_s26, 4  ;;  %s446_s27 = int_to_ptr.vmem [resolvable:$true] %s445_s27 }
 0x2af   :  { %s758_s9 = scalar_lea.vmem %s446_s27, 16  ;;  %s762_s10 = scalar_lea.vmem %s446_s27, 32 }
 0x2b0   :  { %p759_p11 = scmp.ne.s32.totalorder %s446_s27, %s758_s9  ;;  %p763_p12 = scmp.lt.s32.totalorder %s446_s27, %s446_s27 }
 0x2b1   :  { %s649_s28 = spop %648  ;;  %p764_p13 = scmp.lt.s32.totalorder %s762_s10, %s758_s9 }
 0x2b2   :  { %s326_s8 = smul.f32 0.00024414063, %s649_s28 }
 0x2b3   :  { %p765_p0 = por %p764_p13, %p763_p12 }
 0x2b4   :  { %v327_v20 = vstv %s326_s8 }
 0x2b5   :  { %329 = vst.msk [vmem:[#allocation10] sm:$0x1] %vm328_vm0, %v327_v20  ;;  %p766_p1 = pnand %p765_p0, %p759_p11 }
 0x2b7   :  { %769 = shalt.err (!%p766_p1)
}
 0x2b8   :  { %448 = dma.vmem_to_hbm [thread:$0]  %s446_s27, 16, %s887_s6, [#allocation4]  }
 0x2b9   :  { %784 = dma.done.wait [#allocation4], 16  }
 0x2ba   :  { %785 = vsyncadd [#allocation4], 4294967280 }
 0x2bb   :  { %786 = dma.done.wait [#allocation12], 512  }
 0x2bc   :  { %787 = vsyncadd [#allocation12], 4294966784 }
 0x2bd   :  { %467 = vsyncpa [#allocation3], 1 }
 0x2be   :  { %468 = vsyncpa [#allocation6], 1 }
 0x2bf   :  { %469 = vsyncpa [#allocation9], 1 }
 0x2c0   :  { %470 = vsyncpa [#allocation4], 1 }
 0x2c1   :  { %471 = vsyncpa [#allocation12], 1 }

</bundles_post_ra>
